<compile_context>
chip_gen: v7x
topology: tpu7x:2x2x1
jax: 0.10.0
libtpu: 0.0.40
codegen_flags: <defaults>
</compile_context>

<pallas_src>
import functools

import jax
import jax.numpy as jnp
import numpy as np
from jax import lax
from jax.experimental import pallas as pl
from jax.experimental.pallas import tpu as pltpu


def _leaky(x, slope=0.01):
    return jnp.where(x > 0, x, slope * x)


def _roll_lanes(a, off):
    """dest[..., p] = a[..., (p + off) mod N]  (circular lane rotation, XLU)."""
    n = a.shape[-1]
    s = (-off) % n
    if s == 0:
        return a
    return pltpu.roll(a, s, axis=a.ndim - 1)


def se_kernel(x_ref, skip_ref,
              w1_ref, t1_ref, w2_ref, t2_ref,
              d1w_ref, d1b_ref, d2w_ref, d2b_ref,
              out_ref, *, width):
    """One grid step == TB images, channels-major (C, TB*H*W) layout."""
    tb, cx, hw = x_ref.shape
    n = tb * hw
    mxu_dtype = w1_ref.dtype                # f32 (default) or bf16 (opt-in)
    f32 = jnp.float32

    # ---- per-step SAME-padding masks from iota (no HBM inputs needed) -------
    lane = lax.broadcasted_iota(jnp.int32, (1, n), 1)
    col = lane % width                      # column within the image row
    q = lane % hw                           # offset within the image
    mask_l = (col >= 1).astype(f32)         # dx = -1 : source col w-1 valid
    mask_r = (col <= width - 2).astype(f32) # dx = +1 : source col w+1 valid
    mask_t = (q >= width).astype(f32)       # dy = -1 : source row r-1 valid
    mask_b = (q < hw - width).astype(f32)   # dy = +1 : source row r+1 valid

    def im2col(a):
        """(C, N) -> (9C, N) patch matrix, rows ordered (dy, dx, c).

        Column masks are W-periodic, so they commute with the +/-W row rolls;
        row masks also zero anything the circular roll pulled across an image
        (or array) boundary.
        """
        aL = _roll_lanes(a, -1) * mask_l                 # dx = -1
        aR = _roll_lanes(a, +1) * mask_r                 # dx = +1
        base = jnp.concatenate([aL, a, aR], axis=0)      # (3C, N): dx = -1,0,+1
        top = _roll_lanes(base, -width) * mask_t         # dy = -1
        bot = _roll_lanes(base, +width) * mask_b         # dy = +1
        return jnp.concatenate([top, base, bot], axis=0).astype(mxu_dtype)

    # torch.cat([x, skip], dim=1), laid out (Ccat, TB*HW) with each image on a
    # lane-aligned HW slab.
    x = x_ref[...]                                        # (TB, Cx, HW)
    skip = skip_ref[...]                                  # (TB, Cskip, HW)
    xl = jnp.concatenate([x[t] for t in range(tb)], axis=1)
    sl = jnp.concatenate([skip[t] for t in range(tb)], axis=1)
    cat = jnp.concatenate([xl, sl], axis=0)               # (Ccat, N) f32

    # SingleConv #1 / #2: one im2col MXU matmul each (K = 9*Cin, N = TB*HW),
    # folded conv-bias/BN add, LeakyReLU.  Accumulation stays f32.
    h1 = _leaky(jnp.dot(w1_ref[...], im2col(cat),
                        preferred_element_type=jnp.float32) + t1_ref[...])
    conc = _leaky(jnp.dot(w2_ref[...], im2col(h1),
                          preferred_element_type=jnp.float32) + t2_ref[...])

    # Squeeze: per-image global average pool over H*W (lane reductions).
    sq = jnp.concatenate(
        [jnp.mean(conc[:, t * hw:(t + 1) * hw], axis=1, keepdims=True)
         for t in range(tb)], axis=1)                     # (Cout, TB)

    # Excitation MLP: Linear -> ReLU -> Linear -> Sigmoid.  Dims are tiny
    # (Cout=8, Chid=2), so use VPU broadcast+reduce unrolled over Chid instead
    # of degenerate MXU matmuls.  d1w is stored pre-transposed as (Cout, Chid).
    d1w = d1w_ref[...]
    d2w = d2w_ref[...]
    chid = d1w.shape[1]
    hid = jnp.concatenate(
        [jnp.sum(d1w[:, j:j + 1] * sq, axis=0, keepdims=True)
         for j in range(chid)], axis=0) + d1b_ref[...]    # (Chid, TB)
    hid = jnp.maximum(hid, 0.0)
    logits = d2b_ref[...]                                 # (Cout, 1)
    for j in range(chid):
        logits = logits + d2w[:, j:j + 1] * hid[j:j + 1, :]
    gate = jax.nn.sigmoid(logits)                         # (Cout, TB)

    # torch.cat([x, conc * gate], dim=1): assemble in registers, single
    # aligned full-block store.
    outs = []
    for t in range(tb):
        scale_t = conc[:, t * hw:(t + 1) * hw] * gate[:, t:t + 1]
        outs.append(jnp.concatenate([x[t], scale_t], axis=0))   # (Cx+Cout, HW)
    out_ref[...] = jnp.stack(outs, axis=0)                # (TB, Cx+Cout, HW)


def _choose_tile_batch(b, cx, cskip, cout, hw):
    """Largest TB dividing B that fits a conservative VMEM budget and keeps
    >= 2 grid steps (v7x megacore + auto-pipeline overlap) whenever B >= 2."""
    cin1 = cx + cskip

    def vmem_bytes(tb):
        io = 2 * tb * hw * (cin1 + cx + cout) * 4              # double-buffered blocks
        live = tb * hw * (9 * cin1 + 9 * cout + cin1 + 2 * cout) * 4  # patches + acts
        return io + live

    budget = 12 * 1024 * 1024   # conservative vs v7x's 64 MiB physical VMEM
    best = 1
    for tb in range(1, b + 1):
        if b % tb:
            continue
        if b >= 2 and b // tb < 2:
            continue
        if vmem_bytes(tb) <= budget:
            best = tb
    return best


def squeeze_excitation_forward(x_nchw, skip_nchw, fp, tile_batch=None):
    """NCHW in / NCHW out, matching SqueezeExcitationLayer.forward (BN eval)."""
    B, Cx, H, W = x_nchw.shape
    Cskip = skip_nchw.shape[1]
    HW = H * W
    Cout = fp['w2f'].shape[0]

    TB = tile_batch if tile_batch is not None else _choose_tile_batch(
        B, Cx, Cskip, Cout, HW)
    assert B % TB == 0
    grid = (B // TB,)

    x3 = x_nchw.reshape(B, Cx, HW)          # free reshapes (row-major NCHW)
    s3 = skip_nchw.reshape(B, Cskip, HW)

    vmem = pl.BlockSpec(memory_space=pltpu.MemorySpace.VMEM)
    out = pl.pallas_call(
        functools.partial(se_kernel, width=W),
        out_shape=jax.ShapeDtypeStruct((B, Cx + Cout, HW), jnp.float32),
        grid=grid,
        in_specs=[
            pl.BlockSpec((TB, Cx, HW), lambda b: (b, 0, 0)),
            pl.BlockSpec((TB, Cskip, HW), lambda b: (b, 0, 0)),
        ] + [vmem] * 8,                     # folded params, VMEM-resident
        out_specs=pl.BlockSpec((TB, Cx + Cout, HW), lambda b: (b, 0, 0)),
        compiler_params=pltpu.CompilerParams(
            dimension_semantics=("parallel",),       # v7x: 2 TCs over grid steps
            vmem_limit_bytes=32 * 1024 * 1024),
    )(x3, s3,
      fp['w1f'], fp['t1'], fp['w2f'], fp['t2'],
      fp['d1wT'], fp['d1b'], fp['d2w'], fp['d2b'])

    return out.reshape(B, Cx + Cout, H, W)


# ----------------------------- parameters ----------------------------------

def make_torch_params(key, cin_total, cout):
    """Deterministic synthetic parameters in PyTorch layouts."""
    cmid = cout
    chid = cout // 4
    ks = jax.random.split(key, 16)

    def u(k, shape, s):
        return jax.random.uniform(k, shape, jnp.float32, -s, s)

    return dict(
        w1=u(ks[0], (cmid, cin_total, 3, 3), 0.3), b1=u(ks[1], (cmid,), 0.1),
        g1=1.0 + u(ks[2], (cmid,), 0.1), be1=u(ks[3], (cmid,), 0.1),
        m1=u(ks[4], (cmid,), 0.2),
        v1=0.5 + jax.random.uniform(ks[5], (cmid,), jnp.float32, 0.0, 1.0),
        w2=u(ks[6], (cout, cmid, 3, 3), 0.3), b2=u(ks[7], (cout,), 0.1),
        g2=1.0 + u(ks[8], (cout,), 0.1), be2=u(ks[9], (cout,), 0.1),
        m2=u(ks[10], (cout,), 0.2),
        v2=0.5 + jax.random.uniform(ks[11], (cout,), jnp.float32, 0.0, 1.0),
        d1w=u(ks[12], (chid, cout), 0.5), d1b=u(ks[13], (chid,), 0.1),
        d2w=u(ks[14], (cout, chid), 0.5), d2b=u(ks[15], (cout,), 0.1),
    )


def _fold_bn(w, b, gamma, beta, mean, var, eps=1e-5):
    """Fold conv bias + eval-mode BatchNorm into per-output-channel (w', t')."""
    s = gamma / jnp.sqrt(var + eps)
    return w * s[:, None, None, None], s * (b - mean) + beta


def fold_params(tp, mxu_dtype=jnp.float32):
    """Kernel-ready params: folded, im2col-transposed conv weights.

    mxu_dtype=jnp.float32 (default) keeps PyTorch-f32 parity; bf16 is opt-in.
    """
    w1f, t1 = _fold_bn(tp['w1'], tp['b1'], tp['g1'], tp['be1'], tp['m1'], tp['v1'])
    w2f, t2 = _fold_bn(tp['w2'], tp['b2'], tp['g2'], tp['be2'], tp['m2'], tp['v2'])
    cmid, cin = tp['w1'].shape[:2]
    cout = tp['w2'].shape[0]
    # (Cout, kh*kw*Cin), column order (dy, dx, c) -- matches the in-kernel patches.
    w1k = jnp.transpose(w1f, (0, 2, 3, 1)).reshape(cmid, 9 * cin).astype(mxu_dtype)
    w2k = jnp.transpose(w2f, (0, 2, 3, 1)).reshape(cout, 9 * cmid).astype(mxu_dtype)
    return dict(
        w1f=w1k, t1=t1.reshape(cmid, 1),
        w2f=w2k, t2=t2.reshape(cout, 1),
        d1wT=jnp.transpose(tp['d1w']),      # (Cout, Chid)
        d1b=tp['d1b'].reshape(-1, 1),       # (Chid, 1)
        d2w=tp['d2w'],                      # (Cout, Chid)
        d2b=tp['d2b'].reshape(-1, 1),       # (Cout, 1)
    )


# ----------------------------- references ----------------------------------

def reference_forward_f32(x, skip, tp):
    """Exact PyTorch(eval) semantics in f32 (lax.conv, HIGHEST precision)."""
    cat = jnp.concatenate([x, skip], axis=1)

    def single_conv(h, w, b, gamma, beta, mean, var):
        y = lax.conv_general_dilated(
            h, w, (1, 1), 'SAME',
            dimension_numbers=('NCHW', 'OIHW', 'NCHW'),
            precision=lax.Precision.HIGHEST)
        y = y + b.reshape(1, -1, 1, 1)
        y = ((y - mean.reshape(1, -1, 1, 1))
             * (gamma.reshape(1, -1, 1, 1) / jnp.sqrt(var.reshape(1, -1, 1, 1) + 1e-5))
             + beta.reshape(1, -1, 1, 1))
        return _leaky(y)

    h1 = single_conv(cat, tp['w1'], tp['b1'], tp['g1'], tp['be1'], tp['m1'], tp['v1'])
    conc = single_conv(h1, tp['w2'], tp['b2'], tp['g2'], tp['be2'], tp['m2'], tp['v2'])
    sq = jnp.mean(conc, axis=(2, 3))
    hid = jnp.maximum(jnp.dot(sq, tp['d1w'].T, precision=lax.Precision.HIGHEST)
                      + tp['d1b'][None, :], 0.0)
    gate = jax.nn.sigmoid(jnp.dot(hid, tp['d2w'].T, precision=lax.Precision.HIGHEST)
                          + tp['d2b'][None, :])
    return jnp.concatenate([x, conc * gate[:, :, None, None]], axis=1)


def reference_forward_quantized(x, skip, tp):
    """Same semantics, but the conv MXU inputs are bf16-quantized like the kernel."""
    q = lambda a: a.astype(jnp.bfloat16).astype(jnp.float32)
    w1f, t1 = _fold_bn(tp['w1'], tp['b1'], tp['g1'], tp['be1'], tp['m1'], tp['v1'])
    w2f, t2 = _fold_bn(tp['w2'], tp['b2'], tp['g2'], tp['be2'], tp['m2'], tp['v2'])
    cat = jnp.concatenate([x, skip], axis=1)

    def conv_act(h, w, t):
        y = lax.conv_general_dilated(
            q(h), q(w), (1, 1), 'SAME',
            dimension_numbers=('NCHW', 'OIHW', 'NCHW'),
            precision=lax.Precision.HIGHEST)
        return _leaky(y + t.reshape(1, -1, 1, 1))

    h1 = conv_act(cat, w1f, t1)
    conc = conv_act(h1, w2f, t2)
    sq = jnp.mean(conc, axis=(2, 3))
    hid = jnp.maximum(jnp.dot(sq, tp['d1w'].T, precision=lax.Precision.HIGHEST)
                      + tp['d1b'][None, :], 0.0)
    gate = jax.nn.sigmoid(jnp.dot(hid, tp['d2w'].T, precision=lax.Precision.HIGHEST)
                          + tp['d2b'][None, :])
    return jnp.concatenate([x, conc * gate[:, :, None, None]], axis=1)


# ------------------------------- test ---------------------------------------

if __name__ == "__main__":
    key = jax.random.PRNGKey(0)
    kx, k_skip, kp = jax.random.split(key, 3)

    # B=4 so the batched-tile path is exercised (TB=2) while the grid keeps
    # 2 steps (v7x megacore / pipelining).
    B, Cx, Cskip, Cout, H, W = 4, 4, 4, 8, 16, 16
    x = jax.random.normal(kx, (B, Cx, H, W), jnp.float32)
    skip = jax.random.normal(k_skip, (B, Cskip, H, W), jnp.float32)
    tp = make_torch_params(kp, Cx + Cskip, Cout)

    fwd = jax.jit(squeeze_excitation_forward)

    # --- default f32 path: tight check against exact PyTorch(eval) semantics ---
    fp32 = fold_params(tp)                     # f32 MXU inputs (default)
    out32 = jax.block_until_ready(fwd(x, skip, fp32))
    assert out32.shape == (B, Cx + Cout, H, W), out32.shape
    ref = reference_forward_f32(x, skip, tp)
    np.testing.assert_allclose(np.asarray(out32), np.asarray(ref),
                               atol=1e-4, rtol=1e-4)

    # --- opt-in bf16-MXU path (f32 accumulation kept) ---
    fpbf = fold_params(tp, mxu_dtype=jnp.bfloat16)
    outbf = jax.block_until_ready(fwd(x, skip, fpbf))
    refq = reference_forward_quantized(x, skip, tp)
    # Tolerance covers f32 accumulation-order / intermediate bf16 rounding only.
    np.testing.assert_allclose(np.asarray(outbf), np.asarray(refq),
                               atol=2e-2, rtol=2e-2)
    # Coarse sanity bound vs. the strict f32 reference (pure bf16-input drift).
    assert float(jnp.max(jnp.abs(outbf - ref))) < 0.25

    print("KERNEL_OK")
</pallas_src>

<mosaic_0001>
module attributes {stable_mosaic.version = 11 : i64} {
  func.func @se_kernel(%arg0: i32, %arg1: memref<2x4x256xf32, #tpu.memory_space<vmem>>, %arg2: memref<2x4x256xf32, #tpu.memory_space<vmem>>, %arg3: memref<8x72xf32, #tpu.memory_space<vmem>>, %arg4: memref<8x1xf32, #tpu.memory_space<vmem>>, %arg5: memref<8x72xf32, #tpu.memory_space<vmem>>, %arg6: memref<8x1xf32, #tpu.memory_space<vmem>>, %arg7: memref<8x2xf32, #tpu.memory_space<vmem>>, %arg8: memref<2x1xf32, #tpu.memory_space<vmem>>, %arg9: memref<8x2xf32, #tpu.memory_space<vmem>>, %arg10: memref<8x1xf32, #tpu.memory_space<vmem>>, %arg11: memref<2x12x256xf32, #tpu.memory_space<vmem>>) attributes {dimension_semantics = [#tpu.dimension_semantics<parallel>], iteration_bounds = array<i64: 2>, scalar_prefetch = 0 : i64, scratch_operands = 0 : i64, tpu.core_type = #tpu.core_type<tc>, window_params = [{transform_indices = @transform_0, window_bounds = array<i64: 2, 4, 256>}, {transform_indices = @transform_1, window_bounds = array<i64: 2, 4, 256>}, {pipeline_mode = #tpu.pipeline_mode<synchronous>, transform_indices = @transform_2, window_bounds = array<i64: 8, 72>}, {pipeline_mode = #tpu.pipeline_mode<synchronous>, transform_indices = @transform_3, window_bounds = array<i64: 8, 1>}, {pipeline_mode = #tpu.pipeline_mode<synchronous>, transform_indices = @transform_4, window_bounds = array<i64: 8, 72>}, {pipeline_mode = #tpu.pipeline_mode<synchronous>, transform_indices = @transform_5, window_bounds = array<i64: 8, 1>}, {pipeline_mode = #tpu.pipeline_mode<synchronous>, transform_indices = @transform_6, window_bounds = array<i64: 8, 2>}, {pipeline_mode = #tpu.pipeline_mode<synchronous>, transform_indices = @transform_7, window_bounds = array<i64: 2, 1>}, {pipeline_mode = #tpu.pipeline_mode<synchronous>, transform_indices = @transform_8, window_bounds = array<i64: 8, 2>}, {pipeline_mode = #tpu.pipeline_mode<synchronous>, transform_indices = @transform_9, window_bounds = array<i64: 8, 1>}, {transform_indices = @transform_10, window_bounds = array<i64: 2, 12, 256>}]} {
    %0 = tpu.iota {dimensions = array<i32: 1>} : vector<1x512xi32>
    %c16_i32 = arith.constant 16 : i32
    %c0_i32 = arith.constant 0 : i32
    %1 = arith.cmpi eq, %c16_i32, %c0_i32 : i32
    %c1_i32 = arith.constant 1 : i32
    %2 = arith.select %1, %c1_i32, %c16_i32 : i32
    %3 = vector.broadcast %2 : i32 to vector<1x512xi32>
    %4 = arith.remsi %0, %3 : vector<1x512xi32>
    %c0_i32_0 = arith.constant 0 : i32
    %5 = vector.broadcast %c0_i32_0 : i32 to vector<1x512xi32>
    %6 = arith.cmpi ne, %4, %5 : vector<1x512xi32>
    %c0_i32_1 = arith.constant 0 : i32
    %7 = vector.broadcast %c0_i32_1 : i32 to vector<1x512xi32>
    %8 = arith.cmpi slt, %4, %7 : vector<1x512xi32>
    %c0_i32_2 = arith.constant 0 : i32
    %9 = arith.cmpi slt, %2, %c0_i32_2 : i32
    %10 = vector.broadcast %9 : i1 to vector<1x512xi1>
    %11 = vector.broadcast %10 : vector<1x512xi1> to vector<1x512xi1>
    %12 = arith.xori %8, %11 : vector<1x512xi1>
    %13 = arith.andi %12, %6 : vector<1x512xi1>
    %14 = vector.broadcast %2 : i32 to vector<1x512xi32>
    %15 = arith.addi %4, %14 : vector<1x512xi32>
    %16 = arith.select %13, %15, %4 : vector<1x512xi1>, vector<1x512xi32>
    %c256_i32 = arith.constant 256 : i32
    %c0_i32_3 = arith.constant 0 : i32
    %17 = arith.cmpi eq, %c256_i32, %c0_i32_3 : i32
    %c1_i32_4 = arith.constant 1 : i32
    %18 = arith.select %17, %c1_i32_4, %c256_i32 : i32
    %19 = vector.broadcast %18 : i32 to vector<1x512xi32>
    %20 = arith.remsi %0, %19 : vector<1x512xi32>
    %c0_i32_5 = arith.constant 0 : i32
    %21 = vector.broadcast %c0_i32_5 : i32 to vector<1x512xi32>
    %22 = arith.cmpi ne, %20, %21 : vector<1x512xi32>
    %c0_i32_6 = arith.constant 0 : i32
    %23 = vector.broadcast %c0_i32_6 : i32 to vector<1x512xi32>
    %24 = arith.cmpi slt, %20, %23 : vector<1x512xi32>
    %c0_i32_7 = arith.constant 0 : i32
    %25 = arith.cmpi slt, %18, %c0_i32_7 : i32
    %26 = vector.broadcast %25 : i1 to vector<1x512xi1>
    %27 = vector.broadcast %26 : vector<1x512xi1> to vector<1x512xi1>
    %28 = arith.xori %24, %27 : vector<1x512xi1>
    %29 = arith.andi %28, %22 : vector<1x512xi1>
    %30 = vector.broadcast %18 : i32 to vector<1x512xi32>
    %31 = arith.addi %20, %30 : vector<1x512xi32>
    %32 = arith.select %29, %31, %20 : vector<1x512xi1>, vector<1x512xi32>
    %c1_i32_8 = arith.constant 1 : i32
    %33 = vector.broadcast %c1_i32_8 : i32 to vector<1x512xi32>
    %34 = arith.cmpi sge, %16, %33 : vector<1x512xi32>
    %35 = arith.extui %34 : vector<1x512xi1> to vector<1x512xi32>
    %36 = arith.sitofp %35 : vector<1x512xi32> to vector<1x512xf32>
    %c14_i32 = arith.constant 14 : i32
    %37 = vector.broadcast %c14_i32 : i32 to vector<1x512xi32>
    %38 = arith.cmpi sle, %16, %37 : vector<1x512xi32>
    %39 = arith.extui %38 : vector<1x512xi1> to vector<1x512xi32>
    %40 = arith.sitofp %39 : vector<1x512xi32> to vector<1x512xf32>
    %c16_i32_9 = arith.constant 16 : i32
    %41 = vector.broadcast %c16_i32_9 : i32 to vector<1x512xi32>
    %42 = arith.cmpi sge, %32, %41 : vector<1x512xi32>
    %43 = arith.extui %42 : vector<1x512xi1> to vector<1x512xi32>
    %44 = arith.sitofp %43 : vector<1x512xi32> to vector<1x512xf32>
    %c240_i32 = arith.constant 240 : i32
    %45 = vector.broadcast %c240_i32 : i32 to vector<1x512xi32>
    %46 = arith.cmpi slt, %32, %45 : vector<1x512xi32>
    %47 = arith.extui %46 : vector<1x512xi1> to vector<1x512xi32>
    %48 = arith.sitofp %47 : vector<1x512xi32> to vector<1x512xf32>
    %c0 = arith.constant 0 : index
    %c0_10 = arith.constant 0 : index
    %c0_11 = arith.constant 0 : index
    %49 = vector.load %arg1[%c0, %c0_10, %c0_11] : memref<2x4x256xf32, #tpu.memory_space<vmem>>, vector<2x4x256xf32>
    %c0_12 = arith.constant 0 : index
    %c0_13 = arith.constant 0 : index
    %c0_14 = arith.constant 0 : index
    %50 = vector.load %arg2[%c0_12, %c0_13, %c0_14] : memref<2x4x256xf32, #tpu.memory_space<vmem>>, vector<2x4x256xf32>
    %51 = vector.extract_strided_slice %49 {offsets = [0, 0, 0], sizes = [1, 4, 256], strides = [1, 1, 1]} : vector<2x4x256xf32> to vector<1x4x256xf32>
    %52 = vector.shape_cast %51 : vector<1x4x256xf32> to vector<4x256xf32>
    %53 = vector.extract_strided_slice %49 {offsets = [1, 0, 0], sizes = [1, 4, 256], strides = [1, 1, 1]} : vector<2x4x256xf32> to vector<1x4x256xf32>
    %54 = vector.shape_cast %53 : vector<1x4x256xf32> to vector<4x256xf32>
    %55 = tpu.concatenate %52, %54 in 1 : vector<4x256xf32>, vector<4x256xf32> -> vector<4x512xf32>
    %56 = vector.extract_strided_slice %50 {offsets = [0, 0, 0], sizes = [1, 4, 256], strides = [1, 1, 1]} : vector<2x4x256xf32> to vector<1x4x256xf32>
    %57 = vector.shape_cast %56 : vector<1x4x256xf32> to vector<4x256xf32>
    %58 = vector.extract_strided_slice %50 {offsets = [1, 0, 0], sizes = [1, 4, 256], strides = [1, 1, 1]} : vector<2x4x256xf32> to vector<1x4x256xf32>
    %59 = vector.shape_cast %58 : vector<1x4x256xf32> to vector<4x256xf32>
    %60 = tpu.concatenate %57, %59 in 1 : vector<4x256xf32>, vector<4x256xf32> -> vector<4x512xf32>
    %61 = tpu.concatenate %55, %60 in 0 : vector<4x512xf32>, vector<4x512xf32> -> vector<8x512xf32>
    %c0_15 = arith.constant 0 : index
    %c0_16 = arith.constant 0 : index
    %62 = vector.load %arg3[%c0_15, %c0_16] : memref<8x72xf32, #tpu.memory_space<vmem>>, vector<8x72xf32>
    %c1_i32_17 = arith.constant 1 : i32
    %63 = tpu.dynamic_rotate %61 by %c1_i32_17 dim 1 : vector<8x512xf32>, i32 -> vector<8x512xf32>
    %64 = vector.broadcast %36 : vector<1x512xf32> to vector<8x512xf32>
    %65 = arith.mulf %63, %64 : vector<8x512xf32>
    %c511_i32 = arith.constant 511 : i32
    %66 = tpu.dynamic_rotate %61 by %c511_i32 dim 1 : vector<8x512xf32>, i32 -> vector<8x512xf32>
    %67 = vector.broadcast %40 : vector<1x512xf32> to vector<8x512xf32>
    %68 = arith.mulf %66, %67 : vector<8x512xf32>
    %69 = tpu.concatenate %65, %61, %68 in 0 : vector<8x512xf32>, vector<8x512xf32>, vector<8x512xf32> -> vector<24x512xf32>
    %c16_i32_18 = arith.constant 16 : i32
    %70 = tpu.dynamic_rotate %69 by %c16_i32_18 dim 1 : vector<24x512xf32>, i32 -> vector<24x512xf32>
    %71 = vector.broadcast %44 : vector<1x512xf32> to vector<24x512xf32>
    %72 = arith.mulf %70, %71 : vector<24x512xf32>
    %c496_i32 = arith.constant 496 : i32
    %73 = tpu.dynamic_rotate %69 by %c496_i32 dim 1 : vector<24x512xf32>, i32 -> vector<24x512xf32>
    %74 = vector.broadcast %48 : vector<1x512xf32> to vector<24x512xf32>
    %75 = arith.mulf %73, %74 : vector<24x512xf32>
    %76 = tpu.concatenate %72, %69, %75 in 0 : vector<24x512xf32>, vector<24x512xf32>, vector<24x512xf32> -> vector<72x512xf32>
    %cst = arith.constant dense<0.000000e+00> : vector<8x512xf32>
    %77 = tpu.matmul %62, %76, %cst {dimension_numbers = #tpu.dot_dimension_numbers<[1], [0], [0], [1], [0, 0, 1, 1], [], []>} : vector<8x72xf32>, vector<72x512xf32>, vector<8x512xf32> -> vector<8x512xf32>
    %c0_19 = arith.constant 0 : index
    %c0_20 = arith.constant 0 : index
    %78 = vector.load %arg4[%c0_19, %c0_20] : memref<8x1xf32, #tpu.memory_space<vmem>>, vector<8x1xf32>
    %79 = vector.broadcast %78 : vector<8x1xf32> to vector<8x512xf32>
    %80 = arith.addf %77, %79 : vector<8x512xf32>
    %cst_21 = arith.constant 0.000000e+00 : f32
    %81 = vector.broadcast %cst_21 : f32 to vector<8x512xf32>
    %82 = arith.cmpf ogt, %80, %81 : vector<8x512xf32>
    %cst_22 = arith.constant 0.00999999977 : f32
    %83 = vector.broadcast %cst_22 : f32 to vector<8x512xf32>
    %84 = arith.mulf %83, %80 : vector<8x512xf32>
    %85 = arith.select %82, %80, %84 : vector<8x512xi1>, vector<8x512xf32>
    %c0_23 = arith.constant 0 : index
    %c0_24 = arith.constant 0 : index
    %86 = vector.load %arg5[%c0_23, %c0_24] : memref<8x72xf32, #tpu.memory_space<vmem>>, vector<8x72xf32>
    %c1_i32_25 = arith.constant 1 : i32
    %87 = tpu.dynamic_rotate %85 by %c1_i32_25 dim 1 : vector<8x512xf32>, i32 -> vector<8x512xf32>
    %88 = vector.broadcast %36 : vector<1x512xf32> to vector<8x512xf32>
    %89 = arith.mulf %87, %88 : vector<8x512xf32>
    %c511_i32_26 = arith.constant 511 : i32
    %90 = tpu.dynamic_rotate %85 by %c511_i32_26 dim 1 : vector<8x512xf32>, i32 -> vector<8x512xf32>
    %91 = vector.broadcast %40 : vector<1x512xf32> to vector<8x512xf32>
    %92 = arith.mulf %90, %91 : vector<8x512xf32>
    %93 = tpu.concatenate %89, %85, %92 in 0 : vector<8x512xf32>, vector<8x512xf32>, vector<8x512xf32> -> vector<24x512xf32>
    %c16_i32_27 = arith.constant 16 : i32
    %94 = tpu.dynamic_rotate %93 by %c16_i32_27 dim 1 : vector<24x512xf32>, i32 -> vector<24x512xf32>
    %95 = vector.broadcast %44 : vector<1x512xf32> to vector<24x512xf32>
    %96 = arith.mulf %94, %95 : vector<24x512xf32>
    %c496_i32_28 = arith.constant 496 : i32
    %97 = tpu.dynamic_rotate %93 by %c496_i32_28 dim 1 : vector<24x512xf32>, i32 -> vector<24x512xf32>
    %98 = vector.broadcast %48 : vector<1x512xf32> to vector<24x512xf32>
    %99 = arith.mulf %97, %98 : vector<24x512xf32>
    %100 = tpu.concatenate %96, %93, %99 in 0 : vector<24x512xf32>, vector<24x512xf32>, vector<24x512xf32> -> vector<72x512xf32>
    %cst_29 = arith.constant dense<0.000000e+00> : vector<8x512xf32>
    %101 = tpu.matmul %86, %100, %cst_29 {dimension_numbers = #tpu.dot_dimension_numbers<[1], [0], [0], [1], [0, 0, 1, 1], [], []>} : vector<8x72xf32>, vector<72x512xf32>, vector<8x512xf32> -> vector<8x512xf32>
    %c0_30 = arith.constant 0 : index
    %c0_31 = arith.constant 0 : index
    %102 = vector.load %arg6[%c0_30, %c0_31] : memref<8x1xf32, #tpu.memory_space<vmem>>, vector<8x1xf32>
    %103 = vector.broadcast %102 : vector<8x1xf32> to vector<8x512xf32>
    %104 = arith.addf %101, %103 : vector<8x512xf32>
    %cst_32 = arith.constant 0.000000e+00 : f32
    %105 = vector.broadcast %cst_32 : f32 to vector<8x512xf32>
    %106 = arith.cmpf ogt, %104, %105 : vector<8x512xf32>
    %cst_33 = arith.constant 0.00999999977 : f32
    %107 = vector.broadcast %cst_33 : f32 to vector<8x512xf32>
    %108 = arith.mulf %107, %104 : vector<8x512xf32>
    %109 = arith.select %106, %104, %108 : vector<8x512xi1>, vector<8x512xf32>
    %110 = vector.extract_strided_slice %109 {offsets = [0, 0], sizes = [8, 256], strides = [1, 1]} : vector<8x512xf32> to vector<8x256xf32>
    %cst_34 = arith.constant dense<0.000000e+00> : vector<8xf32>
    %111 = vector.multi_reduction <add>, %110, %cst_34 [1] : vector<8x256xf32> to vector<8xf32>
    %112 = vector.shape_cast %111 : vector<8xf32> to vector<8x1xf32>
    %cst_35 = arith.constant 2.560000e+02 : f32
    %113 = vector.broadcast %cst_35 : f32 to vector<8x1xf32>
    %114 = arith.divf %112, %113 : vector<8x1xf32>
    %115 = vector.extract_strided_slice %109 {offsets = [0, 256], sizes = [8, 256], strides = [1, 1]} : vector<8x512xf32> to vector<8x256xf32>
    %cst_36 = arith.constant dense<0.000000e+00> : vector<8xf32>
    %116 = vector.multi_reduction <add>, %115, %cst_36 [1] : vector<8x256xf32> to vector<8xf32>
    %117 = vector.shape_cast %116 : vector<8xf32> to vector<8x1xf32>
    %cst_37 = arith.constant 2.560000e+02 : f32
    %118 = vector.broadcast %cst_37 : f32 to vector<8x1xf32>
    %119 = arith.divf %117, %118 : vector<8x1xf32>
    %120 = tpu.concatenate %114, %119 in 1 : vector<8x1xf32>, vector<8x1xf32> -> vector<8x2xf32>
    %c0_38 = arith.constant 0 : index
    %c0_39 = arith.constant 0 : index
    %121 = vector.load %arg7[%c0_38, %c0_39] : memref<8x2xf32, #tpu.memory_space<vmem>>, vector<8x2xf32>
    %c0_40 = arith.constant 0 : index
    %c0_41 = arith.constant 0 : index
    %122 = vector.load %arg9[%c0_40, %c0_41] : memref<8x2xf32, #tpu.memory_space<vmem>>, vector<8x2xf32>
    %123 = vector.extract_strided_slice %121 {offsets = [0, 0], sizes = [8, 1], strides = [1, 1]} : vector<8x2xf32> to vector<8x1xf32>
    %124 = vector.broadcast %123 : vector<8x1xf32> to vector<8x2xf32>
    %125 = arith.mulf %124, %120 : vector<8x2xf32>
    %cst_42 = arith.constant dense<0.000000e+00> : vector<2xf32>
    %126 = vector.multi_reduction <add>, %125, %cst_42 [0] : vector<8x2xf32> to vector<2xf32>
    %127 = vector.shape_cast %126 : vector<2xf32> to vector<1x2xf32>
    %128 = vector.extract_strided_slice %121 {offsets = [0, 1], sizes = [8, 1], strides = [1, 1]} : vector<8x2xf32> to vector<8x1xf32>
    %129 = vector.broadcast %128 : vector<8x1xf32> to vector<8x2xf32>
    %130 = arith.mulf %129, %120 : vector<8x2xf32>
    %cst_43 = arith.constant dense<0.000000e+00> : vector<2xf32>
    %131 = vector.multi_reduction <add>, %130, %cst_43 [0] : vector<8x2xf32> to vector<2xf32>
    %132 = vector.shape_cast %131 : vector<2xf32> to vector<1x2xf32>
    %133 = tpu.concatenate %127, %132 in 0 : vector<1x2xf32>, vector<1x2xf32> -> vector<2x2xf32>
    %c0_44 = arith.constant 0 : index
    %c0_45 = arith.constant 0 : index
    %134 = vector.load %arg8[%c0_44, %c0_45] : memref<2x1xf32, #tpu.memory_space<vmem>>, vector<2x1xf32>
    %135 = vector.broadcast %134 : vector<2x1xf32> to vector<2x2xf32>
    %136 = arith.addf %133, %135 : vector<2x2xf32>
    %cst_46 = arith.constant 0.000000e+00 : f32
    %137 = vector.broadcast %cst_46 : f32 to vector<2x2xf32>
    %138 = arith.maximumf %136, %137 : vector<2x2xf32>
    %c0_47 = arith.constant 0 : index
    %c0_48 = arith.constant 0 : index
    %139 = vector.load %arg10[%c0_47, %c0_48] : memref<8x1xf32, #tpu.memory_space<vmem>>, vector<8x1xf32>
    %140 = vector.extract_strided_slice %122 {offsets = [0, 0], sizes = [8, 1], strides = [1, 1]} : vector<8x2xf32> to vector<8x1xf32>
    %141 = vector.extract_strided_slice %138 {offsets = [0, 0], sizes = [1, 2], strides = [1, 1]} : vector<2x2xf32> to vector<1x2xf32>
    %142 = vector.broadcast %140 : vector<8x1xf32> to vector<8x2xf32>
    %143 = vector.broadcast %141 : vector<1x2xf32> to vector<8x2xf32>
    %144 = arith.mulf %142, %143 : vector<8x2xf32>
    %145 = vector.broadcast %139 : vector<8x1xf32> to vector<8x2xf32>
    %146 = arith.addf %145, %144 : vector<8x2xf32>
    %147 = vector.extract_strided_slice %122 {offsets = [0, 1], sizes = [8, 1], strides = [1, 1]} : vector<8x2xf32> to vector<8x1xf32>
    %148 = vector.extract_strided_slice %138 {offsets = [1, 0], sizes = [1, 2], strides = [1, 1]} : vector<2x2xf32> to vector<1x2xf32>
    %149 = vector.broadcast %147 : vector<8x1xf32> to vector<8x2xf32>
    %150 = vector.broadcast %148 : vector<1x2xf32> to vector<8x2xf32>
    %151 = arith.mulf %149, %150 : vector<8x2xf32>
    %152 = arith.addf %146, %151 : vector<8x2xf32>
    %153 = arith.negf %152 : vector<8x2xf32>
    %154 = math.exp %153 : vector<8x2xf32>
    %cst_49 = arith.constant 1.000000e+00 : f32
    %155 = vector.broadcast %cst_49 : f32 to vector<8x2xf32>
    %156 = arith.addf %155, %154 : vector<8x2xf32>
    %157 = arith.divf %155, %156 : vector<8x2xf32>
    %158 = vector.extract_strided_slice %109 {offsets = [0, 0], sizes = [8, 256], strides = [1, 1]} : vector<8x512xf32> to vector<8x256xf32>
    %159 = vector.extract_strided_slice %157 {offsets = [0, 0], sizes = [8, 1], strides = [1, 1]} : vector<8x2xf32> to vector<8x1xf32>
    %160 = vector.broadcast %159 : vector<8x1xf32> to vector<8x256xf32>
    %161 = arith.mulf %158, %160 : vector<8x256xf32>
    %162 = vector.extract_strided_slice %49 {offsets = [0, 0, 0], sizes = [1, 4, 256], strides = [1, 1, 1]} : vector<2x4x256xf32> to vector<1x4x256xf32>
    %163 = vector.shape_cast %162 : vector<1x4x256xf32> to vector<4x256xf32>
    %164 = tpu.concatenate %163, %161 in 0 : vector<4x256xf32>, vector<8x256xf32> -> vector<12x256xf32>
    %165 = vector.extract_strided_slice %109 {offsets = [0, 256], sizes = [8, 256], strides = [1, 1]} : vector<8x512xf32> to vector<8x256xf32>
    %166 = vector.extract_strided_slice %157 {offsets = [0, 1], sizes = [8, 1], strides = [1, 1]} : vector<8x2xf32> to vector<8x1xf32>
    %167 = vector.broadcast %166 : vector<8x1xf32> to vector<8x256xf32>
    %168 = arith.mulf %165, %167 : vector<8x256xf32>
    %169 = vector.extract_strided_slice %49 {offsets = [1, 0, 0], sizes = [1, 4, 256], strides = [1, 1, 1]} : vector<2x4x256xf32> to vector<1x4x256xf32>
    %170 = vector.shape_cast %169 : vector<1x4x256xf32> to vector<4x256xf32>
    %171 = tpu.concatenate %170, %168 in 0 : vector<4x256xf32>, vector<8x256xf32> -> vector<12x256xf32>
    %172 = vector.shape_cast %164 : vector<12x256xf32> to vector<1x12x256xf32>
    %173 = vector.shape_cast %171 : vector<12x256xf32> to vector<1x12x256xf32>
    %174 = tpu.concatenate %172, %173 in 0 : vector<1x12x256xf32>, vector<1x12x256xf32> -> vector<2x12x256xf32>
    %c0_50 = arith.constant 0 : index
    %c0_51 = arith.constant 0 : index
    %c0_52 = arith.constant 0 : index
    %175 = vector.load %arg11[%c0_50, %c0_51, %c0_52] : memref<2x12x256xf32, #tpu.memory_space<vmem>>, vector<2x12x256xf32>
    tpu.vector_store %arg11[%c0_50, %c0_51, %c0_52], %174 {strides = array<i32>} : memref<2x12x256xf32, #tpu.memory_space<vmem>>, vector<2x12x256xf32>,
    return
  }
  func.func @transform_0(%arg0: i32) -> (i32, i32, i32) {
    %c0_i32 = arith.constant 0 : i32
    %c0_i32_0 = arith.constant 0 : i32
    %c0_i32_1 = arith.constant 0 : i32
    return %arg0, %c0_i32, %c0_i32_0 : i32, i32, i32
  }
  func.func @transform_1(%arg0: i32) -> (i32, i32, i32) {
    %c0_i32 = arith.constant 0 : i32
    %c0_i32_0 = arith.constant 0 : i32
    %c0_i32_1 = arith.constant 0 : i32
    return %arg0, %c0_i32, %c0_i32_0 : i32, i32, i32
  }
  func.func @transform_2(%arg0: i32) -> (i32, i32) {
    %c0_i32 = arith.constant 0 : i32
    %c0_i32_0 = arith.constant 0 : i32
    %c0_i32_1 = arith.constant 0 : i32
    return %c0_i32, %c0_i32_0 : i32, i32
  }
  func.func @transform_3(%arg0: i32) -> (i32, i32) {
    %c0_i32 = arith.constant 0 : i32
    %c0_i32_0 = arith.constant 0 : i32
    %c0_i32_1 = arith.constant 0 : i32
    return %c0_i32, %c0_i32_0 : i32, i32
  }
  func.func @transform_4(%arg0: i32) -> (i32, i32) {
    %c0_i32 = arith.constant 0 : i32
    %c0_i32_0 = arith.constant 0 : i32
    %c0_i32_1 = arith.constant 0 : i32
    return %c0_i32, %c0_i32_0 : i32, i32
  }
  func.func @transform_5(%arg0: i32) -> (i32, i32) {
    %c0_i32 = arith.constant 0 : i32
    %c0_i32_0 = arith.constant 0 : i32
    %c0_i32_1 = arith.constant 0 : i32
    return %c0_i32, %c0_i32_0 : i32, i32
  }
  func.func @transform_6(%arg0: i32) -> (i32, i32) {
    %c0_i32 = arith.constant 0 : i32
    %c0_i32_0 = arith.constant 0 : i32
    %c0_i32_1 = arith.constant 0 : i32
    return %c0_i32, %c0_i32_0 : i32, i32
  }
  func.func @transform_7(%arg0: i32) -> (i32, i32) {
    %c0_i32 = arith.constant 0 : i32
    %c0_i32_0 = arith.constant 0 : i32
    %c0_i32_1 = arith.constant 0 : i32
    return %c0_i32, %c0_i32_0 : i32, i32
  }
  func.func @transform_8(%arg0: i32) -> (i32, i32) {
    %c0_i32 = arith.constant 0 : i32
    %c0_i32_0 = arith.constant 0 : i32
    %c0_i32_1 = arith.constant 0 : i32
    return %c0_i32, %c0_i32_0 : i32, i32
  }
  func.func @transform_9(%arg0: i32) -> (i32, i32) {
    %c0_i32 = arith.constant 0 : i32
    %c0_i32_0 = arith.constant 0 : i32
    %c0_i32_1 = arith.constant 0 : i32
    return %c0_i32, %c0_i32_0 : i32, i32
  }
  func.func @transform_10(%arg0: i32) -> (i32, i32, i32) {
    %c0_i32 = arith.constant 0 : i32
    %c0_i32_0 = arith.constant 0 : i32
    %c0_i32_1 = arith.constant 0 : i32
    return %arg0, %c0_i32, %c0_i32_0 : i32, i32, i32
  }
}

</mosaic_0001>

<bundles_post_ra>
// kernel: squeeze_excitation_forward.1
= control target key start
LH: loop header
LB: loop body
LE: loop exit
PB: predicated region body
PF: predicated region fallthrough
CT: control target
= control target key end

     0   :  { %s1545_s13 = smov 0   ;;  %s2091_s0 = inlined_call_operand.vmem [shape: f32[4,4,256], index: 0, kind: input, shape index: {}]   ;;  %s2092_s1 = inlined_call_operand.vmem [shape: f32[4,4,256], index: 1, kind: input, shape index: {}]   ;;  %s2093_s2 = inlined_call_operand.vmem [shape: f32[8,72], index: 2, kind: input, shape index: {}]   ;;  %s2094_s3 = inlined_call_operand.vmem [shape: f32[8,1], index: 3, kind: input, shape index: {}]   ;;  %s2095_s4 = inlined_call_operand.vmem [shape: f32[8,72], index: 4, kind: input, shape index: {}]   ;;  %s2096_s5 = inlined_call_operand.vmem [shape: f32[8,1], index: 5, kind: input, shape index: {}]   ;;  %s2097_s6 = inlined_call_operand.vmem [shape: f32[8,2], index: 6, kind: input, shape index: {}]   ;;  %s2098_s7 = inlined_call_operand.vmem [shape: f32[2,1], index: 7, kind: input, shape index: {}]   ;;  %s2099_s8 = inlined_call_operand.vmem [shape: f32[8,2], index: 8, kind: input, shape index: {}]   ;;  %s2100_s9 = inlined_call_operand.vmem [shape: f32[8,1], index: 9, kind: input, shape index: {}]   ;;  %s2101_s10 = inlined_call_operand.vmem [shape: f32[4,12,256], index: 10, kind: output, shape index: {}]  }
   0x1 LB: > { %s1347_s14 = sadd.s32 4294967295, %s1481_s13   ;;  %p1351_p0 = scmp.ge.s32.totalorder %s1481_s13, 1  ;;  %s1481_s13 = sphi %s1545_s13, %s20_s13  }
   0x2   : > { %p326_p1 = scmp.lt.s32.totalorder %s1481_s13, 3 }
   0x4   : > { %p327_p2 = pnand %p1351_p0, %p326_p1 }
   0x5   : > { %s1352_s15 = sshll.u32 (!%p327_p2), %s1347_s14, 1  ;;  %v1483_v0 = vmov (!%p327_p2), 0.0   ;;  %vm564_vm0 = vcmask (!%p327_p2), 1043456   ;;  %s1484_s23 = smov (!%p327_p2), 1   ;;  %v393_v15 = vlaneseq (!%p327_p2)  ;;  %v1488_v56 = vmov (!%p327_p2), 0   ;;  %v702_v57 = vld [vmem:[%s2094_s3] sm:$0xff] (!%p327_p2) }
   0x6   : > { %330 = sbr.rel (%p327_p2) target bundleno = 1372 (0x55c), region = 60  ;;  %p373_p3 = scmp.lt.s32.totalorder (!%p327_p2), %s1352_s15, 3  ;;  %847 = vmatprep.mubr.f32.mxu1 (!%p327_p2), %v1483_v0  ;;  %776 = vmatprep.mubr.f32.mxu0 (!%p327_p2), %v1483_v0 }
   0x7   : > { %s1485_s24 = smov (!%p327_p2), 127   ;;  %s1486_s25 = smov (!%p327_p2), 16   ;;  %v1621_v16 = vand.u32 (!%p327_p2), 127, %v393_v15  ;;  %1462 = vset.pattern.permute.xlu0 (!%p327_p2), %v1488_v56 }
   0x8   : > { %s1487_s26 = smov (!%p327_p2), 112  }
   0x9   : > { %v402_v17 = vand.u32 (!%p327_p2), 15, %v1621_v16  ;;  %v1625_v18 = vadd.s32 (!%p327_p2), 128, %v1621_v16  ;;  %v1628_v20 = vadd.s32 (!%p327_p2), 256, %v1621_v16  ;;  %vm578_vm2 = vcmp.lt.s32.totalorder (!%p327_p2), %v1621_v16, 1 }
   0xa   : > { %v1636_v24 = vadd.s32 (!%p327_p2), 384, %v1621_v16  ;;  %vm595_vm6 = vcmp.lt.s32.totalorder (!%p327_p2), %v1621_v16, 127  ;;  %vm628_vm11 = vcmp.lt.s32.totalorder (!%p327_p2), %v1621_v16, 16  ;;  %vm677_vm15 = vcmp.lt.s32.totalorder (!%p327_p2), %v1621_v16, 112 }
   0xb   : > { %vm494_vm1 = vcmp.ge.s32.totalorder (!%p327_p2), %v402_v17, 1  ;;  %v409_v21 = vand.u32 (!%p327_p2), 15, %v1625_v18  ;;  %v416_v26 = vand.u32 (!%p327_p2), 15, %v1628_v20  ;;  %vm506_vm9 = vcmp.le.s32.totalorder (!%p327_p2), %v402_v17, 14 }
   0xc   : > { %v1633_v23 = vsel (!%p327_p2), %vm494_vm1, 1.0, %v1483_v0  ;;  %v423_v32 = vand.u32 (!%p327_p2), 15, %v1636_v24  ;;  %v1687_v48 = vsel (!%p327_p2), %vm506_vm9, 1.0, %v1483_v0 }
   0xd   : > { %s2103_s15 = smov (!%p373_p3, %s1352_s15), 3  ;;  %vm495_vm3 = vcmp.ge.s32.totalorder %v409_v21, 1  ;;  %vm496_vm4 = vcmp.ge.s32.totalorder %v416_v26, 1  ;;  %vm507_vm5 = vcmp.le.s32.totalorder %v409_v21, 14  ;;  %vm508_vm10 = vcmp.le.s32.totalorder %v416_v26, 14 }
   0xe   : > { %s1380_s16 = sshll.u32 %s2103_s15, 3  ;;  %v1645_v30 = vsel %vm495_vm3, 1.0, %v1483_v0  ;;  %v1656_v36 = vsel %vm496_vm4, 1.0, %v1483_v0  ;;  %vm509_vm7 = vcmp.le.s32.totalorder %v423_v32, 14  ;;  %vm497_vm8 = vcmp.ge.s32.totalorder %v423_v32, 1 }
   0xf   : > { %s377_s19 = scalar_lea.vmem %s2091_s0, %s1380_s16  ;;  %s384_s22 = scalar_lea.vmem %s2092_s1, %s1380_s16  ;;  %v1664_v38 = vsel %vm507_vm5, 1.0, %v1483_v0  ;;  %v1672_v43 = vsel %vm509_vm7, 1.0, %v1483_v0  ;;  %v1677_v45 = vsel %vm497_vm8, 1.0, %v1483_v0  ;;  %v1705_v53 = vsel %vm508_vm10, 1.0, %v1483_v0 }
  0x10   : > { %v1564_v1 = vld [vmem:[%s377_s19 + $0x8] sm:$0xff]  ;;  %v1566_v4 = vld [vmem:[%s377_s19] sm:$0xff]  ;;  %vm708_vm3 = vcmask 588800  }
  0x11   : > { %v545_v2 = vld [vmem:[%s384_s22 + $0x8] sm:$0xff]  ;;  %v544_v5 = vld [vmem:[%s384_s22] sm:$0xff]  ;;  %v1570_v6 = vcombine.high %v1564_v1, %v1564_v1  ;;  %v1574_v9 = vcombine.high %v1566_v4, %v1566_v4 }
  0x12   : > { %v558_v3 = vrot.slane %v545_v2, 4  ;;  %v555_v7 = vcombine.high %v545_v2, %v545_v2  ;;  %v556_v8 = vrot.slane %v544_v5, 4  ;;  %v553_v10 = vcombine.high %v544_v5, %v544_v5 }
  0x13   : > { %v464_v2 = vand.u32 255, %v1628_v20 }
  0x14   : > { %v1578_v11 = vsel %vm564_vm0, %v1564_v1, %v558_v3  ;;  %v1584_v12 = vsel %vm564_vm0, %v1566_v4, %v556_v8  ;;  %v1590_v13 = vsel %vm564_vm0, %v1570_v6, %v555_v7  ;;  %v1594_v14 = vsel %vm564_vm0, %v1574_v9, %v553_v10 }
  0x15   : > { %574 = vrot.lane.b32.xlu1 %v1578_v11, %s1484_s23  ;;  %570 = vrot.lane.b32.xlu0 %v1584_v12, %s1484_s23  ;;  %v450_v3 = vand.u32 255, %v1621_v16  ;;  %vm520_vm12 = vcmp.ge.s32.totalorder %v464_v2, 16 }
  0x17   : > { %vm518_vm13 = vcmp.ge.s32.totalorder %v450_v3, 16 }
  0x19   : > { %576 = vrot.lane.b32.xlu1 %v1590_v13, %s1484_s23  ;;  %572 = vrot.lane.b32.xlu0 %v1594_v14, %s1484_s23 }
  0x1d   : > { %589 = vrot.lane.b32.xlu1 %v1594_v14, %s1485_s24  ;;  %587 = vrot.lane.b32.xlu0 %v1584_v12, %s1485_s24 }
  0x21   : > { %593 = vrot.lane.b32.xlu1 %v1590_v13, %s1485_s24  ;;  %591 = vrot.lane.b32.xlu0 %v1578_v11, %s1485_s24 }
  0x25   : > { %606 = vrot.lane.b32.xlu1 %v1584_v12, %s1486_s25 }
  0x29   : > { %612 = vrot.lane.b32.xlu1 %v1594_v14, %s1486_s25 }
  0x2d   : > { %618 = vrot.lane.b32.xlu1 %v1578_v11, %s1486_s25 }
  0x31   : > { %624 = vrot.lane.b32.xlu1 %v1590_v13, %s1486_s25 }
  0x35   : > { %655 = vrot.lane.b32.xlu1 %v1584_v12, %s1487_s26 }
  0x39   : > { %661 = vrot.lane.b32.xlu1 %v1594_v14, %s1487_s26 }
  0x87   : > { %v575_v19 = vpop.permute.xlu1 %574  ;;  %v571_v22 = vpop.permute.xlu0 %570 }
  0x8b   : > { %v577_v25 = vpop.permute.xlu1 %576  ;;  %v573_v28 = vpop.permute.xlu0 %572 }
  0x8c   : > { %v582_v27 = vsel %vm578_vm2, %v577_v25, %v571_v22  ;;  %v581_v31 = vsel %vm578_vm2, %v571_v22, %v573_v28  ;;  %v580_v37 = vsel %vm578_vm2, %v573_v28, %v575_v19  ;;  %v579_v46 = vsel %vm578_vm2, %v575_v19, %v577_v25 }
  0x8d   : > { %v1642_v29 = vmul.f32 %v1633_v23, %v582_v27  ;;  %v1653_v35 = vmul.f32 %v1645_v30, %v581_v31  ;;  %v1667_v41 = vmul.f32 %v1656_v36, %v580_v37  ;;  %v1697_v51 = vmul.f32 %v1677_v45, %v579_v46 }
  0x8e   : > { %v1754_v19 = vsel %vm520_vm12, 1.0, %v1483_v0  ;;  %v1761_v25 = vsel %vm518_vm13, 1.0, %v1483_v0  ;;  %vm1177_vm12 = vcmask 15360   ;;  %vm1197_vm13 = vcmask 1040384  }
  0x8f   : > { %604 = vrot.lane.b32.xlu0 %v1642_v29, %s1486_s25  ;;  %v590_v33 = vpop.permute.xlu1 %589  ;;  %v588_v34 = vpop.permute.xlu0 %587 }
  0x90   : > { %v598_v49 = vsel %vm595_vm6, %v588_v34, %v590_v33 }
  0x91   : > { %v1700_v52 = vmul.f32 %v1687_v48, %v598_v49 }
  0x93   : > { %610 = vrot.lane.b32.xlu0 %v1653_v35, %s1486_s25  ;;  %v594_v39 = vpop.permute.xlu1 %593  ;;  %v592_v40 = vpop.permute.xlu0 %591 }
  0x94   : > { %v597_v42 = vsel %vm595_vm6, %v590_v33, %v592_v40  ;;  %v599_v44 = vsel %vm595_vm6, %v594_v39, %v588_v34  ;;  %v596_v54 = vsel %vm595_vm6, %v592_v40, %v594_v39 }
  0x95   : > { %v1682_v47 = vmul.f32 %v1664_v38, %v597_v42  ;;  %v1692_v50 = vmul.f32 %v1672_v43, %v599_v44  ;;  %v1712_v55 = vmul.f32 %v1705_v53, %v596_v54 }
  0x97   : > { %616 = vrot.lane.b32.xlu0 %v1667_v41, %s1486_s25  ;;  %614 = vrot.lane.b32.xlu1 %v1682_v47, %s1486_s25  ;;  %v607_v58 = vpop.permute.xlu1 %606 }
  0x9b   : > { %622 = vrot.lane.b32.xlu0 %v1697_v51, %s1486_s25  ;;  %626 = vrot.lane.b32.xlu1 %v1692_v50, %s1486_s25  ;;  %v613_v59 = vpop.permute.xlu1 %612 }
  0x9c   : > { %v636_v5 = vsel %vm628_vm11, %v607_v58, %v613_v59 }
  0x9f   : > { %608 = vrot.lane.b32.xlu0 %v1700_v52, %s1486_s25  ;;  %667 = vrot.lane.b32.xlu1 %v1578_v11, %s1487_s26  ;;  %v619_v60 = vpop.permute.xlu1 %618 }
  0xa0   : > { %v633_v20 = vsel %vm628_vm11, %v613_v59, %v619_v60 }
  0xa1   : > { %v647_v27 = vmul.f32 %v1754_v19, %v633_v20  ;;  %v1393_v20 = vpack.c.bf16 %v1700_v52, %v1584_v12 }
  0xa3   : > { %620 = vrot.lane.b32.xlu0 %v1712_v55, %s1486_s25  ;;  %673 = vrot.lane.b32.xlu1 %v1590_v13, %s1487_s26  ;;  %v625_v61 = vpop.permute.xlu1 %624 }
  0xa4   : > { %v639_v28 = vsel %vm628_vm11, %v625_v61, %v607_v58  ;;  %v630_v32 = vsel %vm628_vm11, %v619_v60, %v625_v61 }
  0xa5   : > { %v645_v39 = vmul.f32 %v1761_v25, %v639_v28 }
  0xa7   : > { %653 = vrot.lane.b32.xlu0 %v1642_v29, %s1487_s26  ;;  %663 = vrot.lane.b32.xlu1 %v1682_v47, %s1487_s26  ;;  %v1742_v62 = vpop.permute.xlu1 %655 }
  0xab   : > { %659 = vrot.lane.b32.xlu0 %v1653_v35, %s1487_s26  ;;  %675 = vrot.lane.b32.xlu1 %v1692_v50, %s1487_s26  ;;  %v1749_v7 = vpop.permute.xlu1 %661 }
  0xac   : > { %v685_v28 = vsel %vm677_vm15, %v1742_v62, %v1749_v7 }
  0xaf   : > { %665 = vrot.lane.b32.xlu0 %v1667_v41, %s1487_s26 }
  0xb3   : > { %671 = vrot.lane.b32.xlu0 %v1697_v51, %s1487_s26 }
  0xb7   : > { %657 = vrot.lane.b32.xlu0 %v1700_v52, %s1487_s26 }
  0xbb   : > { %669 = vrot.lane.b32.xlu0 %v1712_v55, %s1487_s26 }
  0xbf   : > { %705 = vperm.xlu0 %1462, %v702_v57  }
 0x101   : > { %v605_v63 = vpop.permute.xlu0 %604 }
 0x105   : > { %v611_v8 = vpop.permute.xlu0 %610 }
 0x106   : > { %v635_v10 = vsel %vm628_vm11, %v605_v63, %v611_v8 }
 0x107   : > { %v1383_v17 = vpack.c.bf16 %v636_v5, %v635_v10  ;;  %v1391_v5 = vpack.c.bf16 %v1682_v47, %v1594_v14  ;;  %v471_v14 = vand.u32 255, %v1636_v24 }
 0x109   : > { %1384 = vmatprep.subr.bf16.mxu0 %v1383_v17  ;;  %v617_v21 = vpop.permute.xlu0 %616  ;;  %v615_v26 = vpop.permute.xlu1 %614  ;;  %vm533_vm1 = vcmp.lt.s32.totalorder %v471_v14, 240 }
 0x10a   : > { %v632_v22 = vsel %vm628_vm11, %v611_v8, %v617_v21 }
 0x10b   : > { %v643_v31 = vmul.f32 %v1754_v19, %v632_v22  ;;  %v1407_v22 = vpack.c.bf16 %v1692_v50, %v1590_v13 }
 0x10d   : > { %v623_v33 = vpop.permute.xlu0 %622  ;;  %v1401_v44 = vpack.c.bf16 %v647_v27, %v643_v31  ;;  %v627_v46 = vpop.permute.xlu1 %626 }
 0x10e   : > { %v638_v34 = vsel %vm628_vm11, %v623_v33, %v605_v63  ;;  %v629_v37 = vsel %vm628_vm11, %v617_v21, %v623_v33 }
 0x10f   : > { %v641_v40 = vmul.f32 %v1761_v25, %v638_v34  ;;  %v1399_v42 = vpack.c.bf16 %v630_v32, %v629_v37 }
 0x111   : > { %1400 = vmatprep.subr.bf16.mxu1 %v1399_v42  ;;  %v609_v49 = vpop.permute.xlu0 %608  ;;  %v1385_v54 = vpack.c.bf16 %v645_v39, %v641_v40  ;;  %v668_v8 = vpop.permute.xlu1 %667 }
 0x112   : > { %v637_v57 = vsel %vm628_vm11, %v609_v49, %v615_v26  ;;  %v640_v58 = vsel %vm628_vm11, %v627_v46, %v609_v49  ;;  %1402 = vmatpush1.bf16.msra.mxu1 %v1401_v44  ;;  %v682_v13 = vsel %vm677_vm15, %v1749_v7, %v668_v8 }
 0x113   : > { %v649_v59 = vmul.f32 %v1761_v25, %v640_v58  ;;  %v1387_v60 = vpack.c.bf16 %v1653_v35, %v637_v57  ;;  %1386 = vmatpush1.bf16.msra.mxu0 %v1385_v54  ;;  %v457_v35 = vand.u32 255, %v1625_v18  ;;  %v1409_v18 = vpack.c.bf16 %v1712_v55, %v1578_v11 }
 0x115   : > { %1388 = vmatprep.subr.bf16.mxu0 %v1387_v60  ;;  %v621_v61 = vpop.permute.xlu0 %620  ;;  %v1389_v63 = vpack.c.bf16 %v1642_v29, %v649_v59  ;;  %vm531_vm14 = vcmp.lt.s32.totalorder %v457_v35, 240  ;;  %v674_v47 = vpop.permute.xlu1 %673  ;;  %v569_v60 = vld [vmem:[%s2093_s2] sm:$0xff] }
 0x116   : > { %v631_v2 = vsel %vm628_vm11, %v621_v61, %v627_v46  ;;  %v634_v3 = vsel %vm628_vm11, %v615_v26, %v621_v61  ;;  %v1801_v12 = vsel %vm531_vm14, 1.0, %v1483_v0  ;;  %v1813_v26 = vsel %vm533_vm1, 1.0, %v1483_v0 }
 0x117   : > { %v651_v10 = vmul.f32 %v1754_v19, %v634_v3  ;;  %v1403_v17 = vpack.c.bf16 %v1697_v51, %v631_v2  ;;  %1390 = vmatpush1.bf16.msra.mxu0 %v1389_v63  ;;  %v695_v50 = vmul.f32 %v1801_v12, %v682_v13  ;;  %v688_v27 = vsel %vm677_vm15, %v674_v47, %v1742_v62 }
 0x118   : > { %1392 = vmatprep.subr.bf16.mxu0 %v1391_v5  ;;  %v679_v37 = vsel %vm677_vm15, %v668_v8, %v674_v47  ;;  %v697_v39 = vmul.f32 %v1813_v26, %v688_v27 }
 0x119   : > { %1404 = vmatprep.subr.bf16.mxu1 %v1403_v17  ;;  %v654_v29 = vpop.permute.xlu0 %653  ;;  %v1405_v21 = vpack.c.bf16 %v1667_v41, %v651_v10  ;;  %v664_v52 = vpop.permute.xlu1 %663 }
 0x11b   : > { %1394 = vmatpush1.bf16.msra.mxu0 %v1393_v20  ;;  %1406 = vmatpush1.bf16.msra.mxu1 %v1405_v21 }
 0x11c   : > { %1408 = vmatprep.subr.bf16.mxu1 %v1407_v22 }
 0x11d   : > { %v660_v51 = vpop.permute.xlu0 %659  ;;  %v676_v44 = vpop.permute.xlu1 %675 }
 0x11e   : > { %v684_v11 = vsel %vm677_vm15, %v654_v29, %v660_v51 }
 0x11f   : > { %1410 = vmatpush1.bf16.msra.mxu1 %v1409_v18  ;;  %v1397_v33 = vpack.c.bf16 %v685_v28, %v684_v11 }
 0x121   : > { %v666_v41 = vpop.permute.xlu0 %665 }
 0x122   : > { %v681_v24 = vsel %vm677_vm15, %v660_v51, %v666_v41 }
 0x123   : > { %v691_v55 = vmul.f32 %v1801_v12, %v681_v24 }
 0x125   : > { %v672_v31 = vpop.permute.xlu0 %671  ;;  %v1395_v32 = vpack.c.bf16 %v695_v50, %v691_v55 }
 0x126   : > { %v687_v34 = vsel %vm677_vm15, %v672_v31, %v654_v29  ;;  %v678_v40 = vsel %vm677_vm15, %v666_v41, %v672_v31 }
 0x127   : > { %v693_v42 = vmul.f32 %v1813_v26, %v687_v34  ;;  %1396 = vmatprep.subr.bf16.mxu0 %v1395_v32  ;;  %v1413_v46 = vpack.c.bf16 %v679_v37, %v678_v40 }
 0x128   : > { %1398 = vmatpush1.bf16.msra.mxu0 %v1397_v33 }
 0x129   : > { %v658_v62 = vpop.permute.xlu0 %657  ;;  %v1411_v7 = vpack.c.bf16 %v697_v39, %v693_v42 }
 0x12a   : > { %v689_v49 = vsel %vm677_vm15, %v676_v44, %v658_v62  ;;  %v686_v63 = vsel %vm677_vm15, %v658_v62, %v664_v52 }
 0x12b   : > { %v701_v54 = vmul.f32 %v1813_v26, %v689_v49  ;;  %1412 = vmatprep.subr.bf16.mxu1 %v1411_v7  ;;  %v1489_v7 = vmov 1  }
 0x12c   : > { %1414 = vmatpush1.bf16.msra.mxu1 %v1413_v46  ;;  %1463 = vset.pattern.permute.xlu1 %v1489_v7  ;;  %v1199_v46 = vld [vmem:[%s2098_s7] sm:$0x3] }
 0x12d   : > { %799 = vmatprep.subr.mxu1 %v701_v54  ;;  %v670_v57 = vpop.permute.xlu0 %669 }
 0x12e   : > { %v683_v58 = vsel %vm677_vm15, %v664_v52, %v670_v57  ;;  %v680_v59 = vsel %vm677_vm15, %v670_v57, %v676_v44 }
 0x12f   : > { %v699_v61 = vmul.f32 %v1801_v12, %v683_v58 }
 0x130   : > { %800 = vmatpush1.msra.mxu1 %v680_v59 }
 0x131   : > { %728 = vmatprep.subr.mxu0 %v699_v61  ;;  %1374 = vmatmul.mubr.msk.f32.vlgmr.msra.gmra.mrb[0].mxu1 %vm708_vm3, %v569_v60 }
 0x132   : > { %729 = vmatpush1.msra.mxu0 %v686_v63  ;;  %1139 = vmatprep.mubr.f32.mxu1 %v1483_v0 }
 0x133   : > { %1373 = vmatmul.mubr.msk.f32.vlgmr.msra.gmra.mrb[0].mxu0 %vm708_vm3, %v569_v60 }
 0x134   : > { %1068 = vmatprep.mubr.f32.mxu0 %v1483_v0 }
 0x13e   : > { %v706_v2 = vpop.permute.xlu0 %705 }
 0x204   : > { %v849_v3 = vpop.f32.mrb[0].mxu1 }
 0x205   : > { %v850_v5 = vadd.f32 %v849_v3, %v706_v2  ;;  %v851_v8 = vpop.f32.mrb[1].mxu1 }
 0x206   : > { %v778_v10 = vpop.f32.mrb[0].mxu0  ;;  %v852_v14 = vadd.f32 %v851_v8, %v706_v2 }
 0x207   : > { %v779_v17 = vadd.f32 %v778_v10, %v706_v2  ;;  %v780_v35 = vpop.f32.mrb[1].mxu0  ;;  %vm856_vm4 = vcmp.gt.f32.partialorder %v850_v5, 0.0  ;;  %v860_v29 = vmul.f32 0.01, %v850_v5 }
 0x208   : > { %v781_v20 = vadd.f32 %v780_v35, %v706_v2  ;;  %v861_v51 = vmul.f32 0.01, %v852_v14  ;;  %vm857_vm8 = vcmp.gt.f32.partialorder %v852_v14, 0.0 }
 0x209   : > { %vm854_vm5 = vcmp.gt.f32.partialorder %v779_v17, 0.0  ;;  %v858_v21 = vmul.f32 0.01, %v779_v17  ;;  %v1847_v22 = vsel %vm856_vm4, %v850_v5, %v860_v29 }
 0x20a   : > { %871 = vrot.lane.b32.xlu0 %v1847_v22, %s1484_s23  ;;  %v859_v0 = vmul.f32 0.01, %v781_v20  ;;  %vm855_vm7 = vcmp.gt.f32.partialorder %v781_v20, 0.0  ;;  %v1863_v13 = vsel %vm857_vm8, %v852_v14, %v861_v51 }
 0x20b   : > { %v1851_v47 = vsel %vm854_vm5, %v779_v17, %v858_v21 }
 0x20c   : > { %867 = vrot.lane.b32.xlu1 %v1851_v47, %s1484_s23  ;;  %v1857_v18 = vsel %vm855_vm7, %v781_v20, %v859_v0 }
 0x20e   : > { %883 = vrot.lane.b32.xlu0 %v1851_v47, %s1485_s24 }
 0x210   : > { %869 = vrot.lane.b32.xlu1 %v1857_v18, %s1484_s23 }
 0x212   : > { %887 = vrot.lane.b32.xlu0 %v1847_v22, %s1485_s24 }
 0x214   : > { %873 = vrot.lane.b32.xlu1 %v1863_v13, %s1484_s23 }
 0x218   : > { %885 = vrot.lane.b32.xlu1 %v1857_v18, %s1485_s24 }
 0x21c   : > { %889 = vrot.lane.b32.xlu1 %v1863_v13, %s1485_s24 }
 0x220   : > { %901 = vrot.lane.b32.xlu1 %v1851_v47, %s1486_s25 }
 0x224   : > { %913 = vrot.lane.b32.xlu1 %v1847_v22, %s1486_s25 }
 0x228   : > { %949 = vrot.lane.b32.xlu1 %v1851_v47, %s1487_s26 }
 0x22c   : > { %907 = vrot.lane.b32.xlu1 %v1857_v18, %s1486_s25 }
 0x230   : > { %919 = vrot.lane.b32.xlu1 %v1863_v13, %s1486_s25 }
 0x234   : > { %955 = vrot.lane.b32.xlu1 %v1857_v18, %s1487_s26 }
 0x27c   : > { %v872_v41 = vpop.permute.xlu0 %871 }
 0x27e   : > { %v868_v24 = vpop.permute.xlu1 %867 }
 0x280   : > { %v884_v52 = vpop.permute.xlu0 %883 }
 0x282   : > { %v870_v50 = vpop.permute.xlu1 %869 }
 0x283   : > { %v877_v28 = vsel %vm578_vm2, %v868_v24, %v870_v50 }
 0x284   : > { %v888_v31 = vpop.permute.xlu0 %887  ;;  %v1895_v34 = vmul.f32 %v1645_v30, %v877_v28 }
 0x286   : > { %v874_v11 = vpop.permute.xlu1 %873 }
 0x287   : > { %v878_v55 = vsel %vm578_vm2, %v874_v11, %v868_v24 }
 0x288   : > { %v1886_v27 = vmul.f32 %v1633_v23, %v878_v55  ;;  %v876_v23 = vsel %vm578_vm2, %v870_v50, %v872_v41 }
 0x289   : > { %v1909_v42 = vmul.f32 %v1656_v36, %v876_v23 }
 0x28a   : > { %899 = vrot.lane.b32.xlu0 %v1886_v27, %s1486_s25  ;;  %v886_v32 = vpop.permute.xlu1 %885 }
 0x28b   : > { %v892_v33 = vsel %vm595_vm6, %v886_v32, %v888_v31  ;;  %v893_v62 = vsel %vm595_vm6, %v884_v52, %v886_v32 }
 0x28c   : > { %v1898_v37 = vmul.f32 %v1664_v38, %v892_v33  ;;  %v875_v38 = vsel %vm578_vm2, %v872_v41, %v874_v11  ;;  %v1930_v36 = vmul.f32 %v1687_v48, %v893_v62  ;;  %v995_v48 = vld [vmem:[%s2096_s5] sm:$0xff] }
 0x28d   : > { %v1921_v44 = vmul.f32 %v1677_v45, %v875_v38 }
 0x28e   : > { %905 = vrot.lane.b32.xlu0 %v1895_v34, %s1486_s25  ;;  %909 = vrot.lane.b32.xlu1 %v1898_v37, %s1486_s25  ;;  %v890_v39 = vpop.permute.xlu1 %889 }
 0x28f   : > { %v894_v40 = vsel %vm595_vm6, %v890_v39, %v884_v52 }
 0x290   : > { %v1912_v30 = vmul.f32 %v1672_v43, %v894_v40  ;;  %v891_v43 = vsel %vm595_vm6, %v888_v31, %v890_v39 }
 0x291   : > { %v1939_v45 = vmul.f32 %v1705_v53, %v891_v43  ;;  %v1169_v53 = vld [vmem:[%s2097_s6] sm:$0xff]  ;;  %v1423_v43 = vpack.c.bf16 %v1898_v37, %v1857_v18 }
 0x292   : > { %911 = vrot.lane.b32.xlu0 %v1909_v42, %s1486_s25  ;;  %921 = vrot.lane.b32.xlu1 %v1912_v30, %s1486_s25  ;;  %v902_v49 = vpop.permute.xlu1 %901 }
 0x296   : > { %917 = vrot.lane.b32.xlu0 %v1921_v44, %s1486_s25  ;;  %961 = vrot.lane.b32.xlu1 %v1847_v22, %s1487_s26  ;;  %v914_v54 = vpop.permute.xlu1 %913 }
 0x29a   : > { %903 = vrot.lane.b32.xlu0 %v1930_v36, %s1486_s25  ;;  %967 = vrot.lane.b32.xlu1 %v1863_v13, %s1487_s26  ;;  %v1970_v57 = vpop.permute.xlu1 %949 }
 0x29e   : > { %957 = vrot.lane.b32.xlu1 %v1898_v37, %s1487_s26  ;;  %915 = vrot.lane.b32.xlu0 %v1939_v45, %s1486_s25  ;;  %v908_v58 = vpop.permute.xlu1 %907  ;;  %s1382_s25 = sshll.u32 %s2103_s15, 5 }
 0x29f   : > { %v930_v63 = vsel %vm628_vm11, %v902_v49, %v908_v58  ;;  %v927_v10 = vsel %vm628_vm11, %v908_v58, %v914_v54  ;;  %s391_s28 = scalar_lea.vmem %s2101_s10, %s1382_s25 }
 0x2a0   : > { %v941_v21 = vmul.f32 %v1754_v19, %v927_v10 }
 0x2a2   : > { %969 = vrot.lane.b32.xlu1 %v1912_v30, %s1487_s26  ;;  %947 = vrot.lane.b32.xlu0 %v1886_v27, %s1487_s26  ;;  %v920_v59 = vpop.permute.xlu1 %919 }
 0x2a3   : > { %v933_v35 = vsel %vm628_vm11, %v920_v59, %v902_v49  ;;  %v924_v14 = vsel %vm628_vm11, %v914_v54, %v920_v59  ;;  %v1439_v49 = vpack.c.bf16 %v1912_v30, %v1863_v13 }
 0x2a4   : > { %v939_v41 = vmul.f32 %v1761_v25, %v933_v35 }
 0x2a6   : > { %953 = vrot.lane.b32.xlu0 %v1895_v34, %s1487_s26  ;;  %1186 = vperm.xlu1 %1463, %v1169_v53   ;;  %v956_v3 = vpop.permute.xlu1 %955 }
 0x2aa   : > { %959 = vrot.lane.b32.xlu0 %v1909_v42, %s1487_s26  ;;  %1464 = vset.pattern.permute.xlu1 %v1488_v56 }
 0x2ab   : > { %1202 = vperm.xlu1 %1464, %v1199_v46  }
 0x2ae   : > { %965 = vrot.lane.b32.xlu0 %v1921_v44, %s1487_s26 }
 0x2b2   : > { %951 = vrot.lane.b32.xlu0 %v1930_v36, %s1487_s26 }
 0x2b6   : > { %963 = vrot.lane.b32.xlu0 %v1939_v45, %s1487_s26 }
 0x2ba   : > { %998 = vperm.xlu0 %1462, %v995_v48  }
 0x2be   : > { %1173 = vperm.xlu0 %1462, %v1169_v53  }
 0x2fc   : > { %v900_v60 = vpop.permute.xlu0 %899 }
 0x300   : > { %v906_v61 = vpop.permute.xlu0 %905  ;;  %v910_v17 = vpop.permute.xlu1 %909 }
 0x301   : > { %v929_v2 = vsel %vm628_vm11, %v900_v60, %v906_v61 }
 0x302   : > { %v1415_v5 = vpack.c.bf16 %v930_v63, %v929_v2 }
 0x304   : > { %v912_v8 = vpop.permute.xlu0 %911  ;;  %1416 = vmatprep.subr.bf16.mxu0 %v1415_v5  ;;  %v922_v11 = vpop.permute.xlu1 %921 }
 0x305   : > { %v926_v56 = vsel %vm628_vm11, %v906_v61, %v912_v8 }
 0x306   : > { %v937_v29 = vmul.f32 %v1754_v19, %v926_v56 }
 0x308   : > { %v918_v20 = vpop.permute.xlu0 %917  ;;  %v1433_v52 = vpack.c.bf16 %v941_v21, %v937_v29  ;;  %v962_v48 = vpop.permute.xlu1 %961 }
 0x309   : > { %v923_v0 = vsel %vm628_vm11, %v912_v8, %v918_v20  ;;  %v932_v51 = vsel %vm628_vm11, %v918_v20, %v900_v60 }
 0x30a   : > { %v935_v24 = vmul.f32 %v1761_v25, %v932_v51  ;;  %v1431_v50 = vpack.c.bf16 %v924_v14, %v923_v0  ;;  %v866_v14 = vld [vmem:[%s2095_s4] sm:$0xff] }
 0x30c   : > { %v1417_v55 = vpack.c.bf16 %v939_v41, %v935_v24  ;;  %v904_v28 = vpop.permute.xlu0 %903  ;;  %1432 = vmatprep.subr.bf16.mxu1 %v1431_v50  ;;  %v968_v18 = vpop.permute.xlu1 %967 }
 0x30d   : > { %v931_v31 = vsel %vm628_vm11, %v904_v28, %v910_v17  ;;  %v934_v32 = vsel %vm628_vm11, %v922_v11, %v904_v28  ;;  %1434 = vmatpush1.bf16.msra.mxu1 %v1433_v52  ;;  %v972_v8 = vsel %vm677_vm15, %v962_v48, %v968_v18 }
 0x30e   : > { %v943_v33 = vmul.f32 %v1761_v25, %v934_v32  ;;  %v1419_v23 = vpack.c.bf16 %v1895_v34, %v931_v31  ;;  %1418 = vmatpush1.bf16.msra.mxu0 %v1417_v55 }
 0x310   : > { %v1421_v39 = vpack.c.bf16 %v1886_v27, %v943_v33  ;;  %v916_v40 = vpop.permute.xlu0 %915  ;;  %1420 = vmatprep.subr.bf16.mxu0 %v1419_v23  ;;  %v1425_v27 = vpack.c.bf16 %v1930_v36, %v1851_v47  ;;  %v958_v54 = vpop.permute.xlu1 %957 }
 0x311   : > { %v925_v38 = vsel %vm628_vm11, %v916_v40, %v922_v11  ;;  %v928_v62 = vsel %vm628_vm11, %v910_v17, %v916_v40  ;;  %vm1167_vm11 = vcmask 7168  }
 0x312   : > { %v945_v53 = vmul.f32 %v1754_v19, %v928_v62  ;;  %v1435_v25 = vpack.c.bf16 %v1921_v44, %v925_v38  ;;  %1422 = vmatpush1.bf16.msra.mxu0 %v1421_v39  ;;  %v1441_v19 = vpack.c.bf16 %v1939_v45, %v1847_v22  ;;  %v975_v44 = vsel %vm677_vm15, %v956_v3, %v962_v48  ;;  %v1207_v48 = vld [vmem:[%s2100_s9] sm:$0xff] }
 0x313   : > { %1424 = vmatprep.subr.bf16.mxu0 %v1423_v43  ;;  %v988_v36 = vmul.f32 %v1801_v12, %v975_v44  ;;  %v981_v22 = vsel %vm677_vm15, %v968_v18, %v1970_v57  ;;  %v978_v45 = vsel %vm677_vm15, %v1970_v57, %v956_v3 }
 0x314   : > { %v1437_v34 = vpack.c.bf16 %v1909_v42, %v945_v53  ;;  %v948_v46 = vpop.permute.xlu0 %947  ;;  %1436 = vmatprep.subr.bf16.mxu1 %v1435_v25  ;;  %v990_v63 = vmul.f32 %v1813_v26, %v981_v22  ;;  %v970_v56 = vpop.permute.xlu1 %969  ;;  %v1170_v53 = vld [vmem:[%s2099_s8] sm:$0xff] }
 0x316   : > { %1426 = vmatpush1.bf16.msra.mxu0 %v1425_v27  ;;  %1438 = vmatpush1.bf16.msra.mxu1 %v1437_v34 }
 0x317   : > { %1440 = vmatprep.subr.bf16.mxu1 %v1439_v49 }
 0x318   : > { %v954_v37 = vpop.permute.xlu0 %953 }
 0x319   : > { %v977_v13 = vsel %vm677_vm15, %v948_v46, %v954_v37 }
 0x31a   : > { %1442 = vmatpush1.bf16.msra.mxu1 %v1441_v19  ;;  %v1429_v60 = vpack.c.bf16 %v978_v45, %v977_v13 }
 0x31c   : > { %v960_v47 = vpop.permute.xlu0 %959 }
 0x31d   : > { %v974_v42 = vsel %vm677_vm15, %v954_v37, %v960_v47 }
 0x31e   : > { %v984_v30 = vmul.f32 %v1801_v12, %v974_v42 }
 0x320   : > { %v966_v58 = vpop.permute.xlu0 %965  ;;  %v1427_v59 = vpack.c.bf16 %v988_v36, %v984_v30 }
 0x321   : > { %v980_v61 = vsel %vm677_vm15, %v966_v58, %v948_v46  ;;  %v971_v2 = vsel %vm677_vm15, %v960_v47, %v966_v58 }
 0x322   : > { %v986_v5 = vmul.f32 %v1813_v26, %v980_v61  ;;  %1428 = vmatprep.subr.bf16.mxu0 %v1427_v59  ;;  %v1445_v10 = vpack.c.bf16 %v972_v8, %v971_v2  ;;  %v1214_v2 = vshrl.u32 %v393_v15, 7 }
 0x323   : > { %1430 = vmatpush1.bf16.msra.mxu0 %v1429_v60 }
 0x324   : > { %v952_v57 = vpop.permute.xlu0 %951  ;;  %v1443_v3 = vpack.c.bf16 %v990_v63, %v986_v5 }
 0x325   : > { %v982_v17 = vsel %vm677_vm15, %v970_v56, %v952_v57  ;;  %v1187_v25 = vpop.permute.xlu1 %1186 }
 0x326   : > { %v994_v35 = vmul.f32 %v1813_v26, %v982_v17  ;;  %1444 = vmatprep.subr.bf16.mxu1 %v1443_v3  ;;  %v979_v26 = vsel %vm677_vm15, %v952_v57, %v958_v54  ;;  %v1215_v57 = vsub.s32 0, %v1214_v2 }
 0x327   : > { %1446 = vmatpush1.bf16.msra.mxu1 %v1445_v10  ;;  %v1230_v10 = vsub.s32 1, %v1214_v2 }
 0x328   : > { %v964_v29 = vpop.permute.xlu0 %963  ;;  %1091 = vmatprep.subr.mxu1 %v994_v35 }
 0x329   : > { %v973_v20 = vsel %vm677_vm15, %v964_v29, %v970_v56  ;;  %v976_v21 = vsel %vm677_vm15, %v958_v54, %v964_v29 }
 0x32a   : > { %v992_v0 = vmul.f32 %v1801_v12, %v976_v21  ;;  %v1203_v34 = vpop.permute.xlu1 %1202 }
 0x32b   : > { %1092 = vmatpush1.msra.mxu1 %v973_v20 }
 0x32c   : > { %1020 = vmatprep.subr.mxu0 %v992_v0  ;;  %1376 = vmatmul.mubr.msk.f32.vlgmr.msra.gmra.mrb[2].mxu1 %vm708_vm3, %v866_v14 }
 0x32d   : > { %1021 = vmatpush1.msra.mxu0 %v979_v26 }
 0x32e   : > { %1375 = vmatmul.mubr.msk.f32.vlgmr.msra.gmra.mrb[2].mxu0 %vm708_vm3, %v866_v14 }
 0x339   : > { %v999_v51 = vpop.permute.xlu0 %998 }
 0x33d   : > { %v1174_v27 = vpop.permute.xlu0 %1173 }
 0x3ff   : > { %v1141_v41 = vpop.f32.mrb[2].mxu1 }
 0x400   : > { %v1142_v24 = vadd.f32 %v1141_v41, %v999_v51  ;;  %v1143_v50 = vpop.f32.mrb[3].mxu1 }
 0x401   : > { %v1144_v52 = vadd.f32 %v1143_v50, %v999_v51  ;;  %v1070_v11 = vpop.f32.mrb[2].mxu0 }
 0x402   : > { %v1152_v55 = vmul.f32 0.01, %v1142_v24  ;;  %v1071_v28 = vadd.f32 %v1070_v11, %v999_v51  ;;  %v1072_v31 = vpop.f32.mrb[3].mxu0  ;;  %vm1148_vm2 = vcmp.gt.f32.partialorder %v1142_v24, 0.0 }
 0x403   : > { %v1153_v12 = vmul.f32 0.01, %v1144_v52  ;;  %v1073_v32 = vadd.f32 %v1072_v31, %v999_v51  ;;  %vm1149_vm6 = vcmp.gt.f32.partialorder %v1144_v52, 0.0 }
 0x404   : > { %v1150_v16 = vmul.f32 0.01, %v1071_v28  ;;  %v2051_v33 = vsel %vm1148_vm2, %v1142_v24, %v1152_v55  ;;  %vm1146_vm9 = vcmp.gt.f32.partialorder %v1071_v28, 0.0 }
 0x405   : > { %v1151_v23 = vmul.f32 0.01, %v1073_v32  ;;  %v2053_v39 = vsel %vm1149_vm6, %v1144_v52, %v1153_v12  ;;  %vm1147_vm10 = vcmp.gt.f32.partialorder %v1073_v32, 0.0 }
 0x406   : > { %v1163_v40 = vadd.f32 %v2053_v39, %v2051_v33  ;;  %v2057_v38 = vsel %vm1146_vm9, %v1071_v28, %v1150_v16 }
 0x407   : > { %v2059_v62 = vsel %vm1147_vm10, %v1073_v32, %v1151_v23 }
 0x408   : > { %1164 = vadd.xlane.f32.xlu0 %v1163_v40  ;;  %v1158_v43 = vadd.f32 %v2059_v62, %v2057_v38 }
 0x40a   : > { %1159 = vadd.xlane.f32.xlu1 %v1158_v43 }
 0x41b   : > { %1220 = vperm.xlu1 %1464, %v1207_v48  }
 0x41e   : > { %1210 = vperm.xlu0 %1462, %v1170_v53  }
 0x422   : > { %1465 = vset.pattern.permute.xlu0 %v1489_v7 }
 0x423   : > { %1225 = vperm.xlu0 %1465, %v1170_v53  }
 0x495   : > { %v1165_v46 = vpop.xlane.xlu0 %1164 }
 0x496   : > { %v1166_v19 = vmul.f32 0.00390625, %v1165_v46 }
 0x497   : > { %v1160_v49 = vpop.xlane.xlu1 %1159 }
 0x498   : > { %v1162_v18 = vmul.f32 0.00390625, %v1160_v49 }
 0x49a   : > { %v1168_v37 = vsel %vm1167_vm11, %v1162_v18, %v1166_v19 }
 0x49b   : > { %v1176_v44 = vmul.f32 %v1174_v27, %v1168_v37  ;;  %v1189_v47 = vmul.f32 %v1187_v25, %v1168_v37  ;;  %v1221_v0 = vpop.permute.xlu1 %1220 }
 0x49d   : > { %v1178_v42 = vsel %vm1177_vm12, %v1176_v44, 0.0  ;;  %v1190_v36 = vsel %vm1177_vm12, %v1189_v47, 0.0  ;;  %v1211_v17 = vpop.permute.xlu0 %1210 }
 0x49e   : > { %v1179_v54 = vrot.slane %v1178_v42, 4  ;;  %v1191_v13 = vrot.slane %v1190_v36, 4 }
 0x4a0   : > { %v1180_v30 = vadd.f32 %v1179_v54, %v1178_v42  ;;  %v1192_v22 = vadd.f32 %v1191_v13, %v1190_v36 }
 0x4a2   : > { %v1181_v45 = vrot.slane %v1180_v30, 2  ;;  %v1193_v58 = vrot.slane %v1192_v22, 2  ;;  %v1226_v21 = vpop.permute.xlu0 %1225 }
 0x4a4   : > { %v1182_v59 = vadd.f32 %v1181_v45, %v1180_v30  ;;  %v1194_v60 = vadd.f32 %v1193_v58, %v1192_v22 }
 0x4a6   : > { %v1183_v61 = vrot.slane %v1182_v59, 1  ;;  %v1195_v63 = vrot.slane %v1194_v60, 1 }
 0x4a8   : > { %v1184_v5 = vadd.f32 %v1183_v61, %v1182_v59  ;;  %v1196_v8 = vadd.f32 %v1195_v63, %v1194_v60 }
 0x4aa   : > { %v1198_v56 = vsel %vm1197_vm13, %v1184_v5, %v1196_v8 }
 0x4ab   : > { %v1205_v3 = vadd.f32 %v1203_v34, %v1198_v56 }
 0x4ad   : > { %v1206_v35 = vmax.f32 %v1205_v3, 0.0 }
 0x4af   : > { %v1216_v29 = vrot.slane %v1206_v35, %v1215_v57  ;;  %v1231_v20 = vrot.slane %v1206_v35, %v1230_v10 }
 0x4b1   : > { %v1217_v14 = vmul.f32 %v1216_v29, %v1211_v17  ;;  %v1232_v51 = vmul.f32 %v1231_v20, %v1226_v21 }
 0x4b3   : > { %v1223_v26 = vadd.f32 %v1221_v0, %v1217_v14 }
 0x4b5   : > { %v1233_v41 = vadd.f32 %v1232_v51, %v1223_v26 }
 0x4b7   : > { %v1377_v24 = vmul.f32 -1.442695, %v1233_v41 }
 0x4b9   : > { %1471 = vpow2.f32 %v1377_v24 }
 0x4c3   : > { %v1472_v15 = vpop.eup %1471 }
 0x4c4   : > { %v1237_v50 = vadd.f32 1.0, %v1472_v15 }
 0x4c6   : > { %1473 = vrcp.f32 %v1237_v50 }
 0x4d0   : > { %v1474_v52 = vpop.eup %1473 }
 0x4d1   : > { %1242 = vperm.xlu1 %1464, %v1474_v52  }
 0x4d5   : > { %1466 = vset.pattern.permute.xlu1 %v1489_v7 }
 0x4d6   : > { %1256 = vperm.xlu1 %1466, %v1474_v52  }
 0x550   : > { %v1243_v11 = vpop.permute.xlu1 %1242 }
 0x551   : > { %v1245_v55 = vmul.f32 %v1243_v11, %v2057_v38  ;;  %v1246_v28 = vmul.f32 %v1243_v11, %v2059_v62 }
 0x553   : > { %v1249_v31 = vrot.slane %v1245_v55, 4  ;;  %v1250_v12 = vrot.slane %v1246_v28, 4 }
 0x555   : > { %v1253_v32 = vsel %vm564_vm0, %v1566_v4, %v1249_v31  ;;  %v1254_v16 = vsel %vm564_vm0, %v1574_v9, %v1250_v12  ;;  %1271 = vst [vmem:[%s391_s28 + $0x10] sm:$0xf] %v1249_v31  ;;  %1272 = vst [vmem:[%s391_s28 + $0x18] sm:$0xf] %v1250_v12  ;;  %v1257_v7 = vpop.permute.xlu1 %1256 }
 0x556   : > { %1269 = vst [vmem:[%s391_s28] sm:$0xff] %v1253_v32  ;;  %1270 = vst [vmem:[%s391_s28 + $0x8] sm:$0xff] %v1254_v16  ;;  %v1259_v23 = vmul.f32 %v1257_v7, %v2051_v33  ;;  %v1260_v40 = vmul.f32 %v1257_v7, %v2053_v39 }
 0x558   : > { %v1263_v38 = vrot.slane %v1259_v23, 4  ;;  %v1264_v62 = vrot.slane %v1260_v40, 4 }
 0x55a   : > { %v1267_v43 = vsel %vm564_vm0, %v1564_v1, %v1263_v38  ;;  %v1268_v4 = vsel %vm564_vm0, %v1570_v6, %v1264_v62  ;;  %1275 = vst [vmem:[%s391_s28 + $0x30] sm:$0xf] %v1263_v38  ;;  %1276 = vst [vmem:[%s391_s28 + $0x38] sm:$0xf] %v1264_v62 }
 0x55b   : > { %1273 = vst [vmem:[%s391_s28 + $0x20] sm:$0xff] %v1267_v43  ;;  %1274 = vst [vmem:[%s391_s28 + $0x28] sm:$0xff] %v1268_v4 }
 0x55c PF: > { %s20_s13 = sadd.s32 1, %s1481_s13  }
 0x55d   : > { %p17_p4 = scmp.ge.s32.totalorder %s20_s13, 4  }
 0x55f   :  { %19 = sbr.rel (!%p17_p4) target bundleno = 1 (0x1), region = 93 }

</bundles_post_ra>
